<compile_context>
chip_gen: v5e
topology: v5e:2x2
jax: 0.10.0
libtpu: 0.0.40
codegen_flags: <defaults>
</compile_context>

<pallas_src>
import functools

import jax
import jax.numpy as jnp
from jax.experimental import pallas as pl
from jax.experimental.pallas import tpu as pltpu

_F32_EPS = float(jnp.finfo(jnp.float32).eps)
_VMEM_TILE_BUDGET = 12 * 1024 * 1024        # bytes reserved for pipeline tiles
_VMEM_LIMIT = 32 * 1024 * 1024              # scoped VMEM limit (safe on all gens)


# --------------------------------------------------------------------------
# In-kernel helpers
# --------------------------------------------------------------------------
def _row_mask(tile_n, n_rows):
    """(tile_n, 1) bool mask: True for rows that exist in the real batch."""
    rows = jax.lax.broadcasted_iota(jnp.int32, (tile_n, 1), 0)
    return (pl.program_id(0) * tile_n + rows) < n_rows


def _soft_tile_loss(x_ref, t_ref, row_bool, *, ignore_index, normalize_targets):
    """Soft-target path: per-sample loss + per-row valid mask for one tile."""
    x = x_ref[...].astype(jnp.float32)          # (tile_n, C)
    t = t_ref[...].astype(jnp.float32)          # (tile_n, C)
    n, c = x.shape

    if row_bool is not None:                    # neutralize padded rows
        x = jnp.where(row_bool, x, 0.0)
        t = jnp.where(row_bool, t, 0.0)

    if 0 <= ignore_index <= c - 1:
        drop = t[:, ignore_index:ignore_index + 1] > 0.0        # (tile_n, 1)
        vmask = jnp.where(drop, 0.0, 1.0)
    else:
        vmask = jnp.ones((n, 1), dtype=jnp.float32)
    if row_bool is not None:
        vmask = vmask * row_bool.astype(jnp.float32)

    valid_t = t * vmask
    if normalize_targets:
        tsum = jnp.sum(valid_t, axis=-1, keepdims=True)
        valid_t = valid_t / (_F32_EPS + tsum)

    # fused loss:  -sum(t * log_softmax(x)) = sum(t)*lse - sum(t*shifted)
    x_max = jnp.max(x, axis=-1, keepdims=True)
    shifted = x - x_max
    lse = jnp.log(jnp.sum(jnp.exp(shifted), axis=-1, keepdims=True))
    t_row = jnp.sum(valid_t, axis=-1, keepdims=True)
    tx = jnp.sum(valid_t * shifted, axis=-1, keepdims=True)
    per_sample = t_row * lse - tx               # (tile_n, 1)
    return per_sample, vmask


def _label_tile_loss(x_ref, l_ref, row_bool, *, ignore_index, normalize_targets):
    """Hard-label path: labels are (tile_n, 1) int32; no one-hot in HBM."""
    x = x_ref[...].astype(jnp.float32)          # (tile_n, C)
    labels = l_ref[...].astype(jnp.int32)       # (tile_n, 1)
    n, c = x.shape

    if row_bool is not None:
        x = jnp.where(row_bool, x, 0.0)
        labels = jnp.where(row_bool, labels, jnp.int32(c))      # out-of-range

    if 0 <= ignore_index <= c - 1:
        vmask = jnp.where(labels == ignore_index, 0.0, 1.0)
    else:
        vmask = jnp.ones((n, 1), dtype=jnp.float32)
    if row_bool is not None:
        vmask = vmask * row_bool.astype(jnp.float32)

    # one-hot target sums to vmask, so the normalized scale is vmask/(eps+vmask)
    scale = vmask / (_F32_EPS + vmask) if normalize_targets else vmask

    x_max = jnp.max(x, axis=-1, keepdims=True)
    shifted = x - x_max
    lse = jnp.log(jnp.sum(jnp.exp(shifted), axis=-1, keepdims=True))
    onehot = jax.lax.broadcasted_iota(jnp.int32, (n, c), 1) == labels
    x_at_label = jnp.sum(jnp.where(onehot, shifted, 0.0), axis=-1, keepdims=True)
    per_sample = scale * (lse - x_at_label)     # (tile_n, 1)
    return per_sample, vmask


# --------------------------------------------------------------------------
# Kernels
# --------------------------------------------------------------------------
def _ce_mean_kernel(x_ref, t_ref, out_ref, cnt_ref, *,
                    tile_loss, tile_n, n_rows, mask_rows):
    i = pl.program_id(0)

    @pl.when(i == 0)
    def _init():
        out_ref[...] = jnp.zeros_like(out_ref)
        cnt_ref[...] = jnp.zeros_like(cnt_ref)

    row_bool = _row_mask(tile_n, n_rows) if mask_rows else None
    per_sample, vmask = tile_loss(x_ref, t_ref, row_bool)

    out_ref[...] = out_ref[...] + jnp.sum(per_sample)
    cnt_ref[...] = cnt_ref[...] + jnp.sum(vmask)

    @pl.when(i == pl.num_programs(0) - 1)
    def _finalize():
        out_ref[...] = out_ref[...] / jnp.maximum(cnt_ref[...], 1.0)


def _ce_none_kernel(x_ref, t_ref, out_ref, *,
                    tile_loss, tile_n, n_rows, mask_rows):
    row_bool = _row_mask(tile_n, n_rows) if mask_rows else None
    per_sample, _ = tile_loss(x_ref, t_ref, row_bool)
    out_ref[...] = per_sample                   # (tile_n, 1)


# --------------------------------------------------------------------------
# Wrapper
# --------------------------------------------------------------------------
def _pick_tile_n(n, x_row_bytes, t_row_bytes, c, override):
    if override is not None:
        return min(override, n)
    # double-buffered input tiles + f32 working copies / temporaries
    per_row = 2 * (x_row_bytes + t_row_bytes) + 4 * c * 4
    max_rows = max(int(_VMEM_TILE_BUDGET // per_row), 8)
    if n <= max_rows:
        return n                                # single tile, whole batch
    tile_n = 128
    for cand in (1024, 512, 256, 128):
        if cand <= max_rows:
            tile_n = cand
            break
    # TODO(synk): add a class-axis grid (online logsumexp) for vocab-scale C
    # where even 128 rows x C of f32 temporaries does not fit VMEM.
    return tile_n


def soft_target_cross_entropy_loss(inputs, target, *,
                                   ignore_index: int = -100,
                                   reduction: str = "mean",
                                   normalize_targets: bool = True,
                                   _tile_rows=None):
    """JAX/Pallas equivalent of SoftTargetCrossEntropyLoss.forward."""
    if reduction not in ("mean", "none"):
        raise NotImplementedError(f'reduction type "{reduction}" not implemented')

    inputs = jnp.asarray(inputs)                # keep native dtype (cast in-kernel)
    target = jnp.asarray(target)
    n, c = inputs.shape

    int_labels = target.ndim == 1
    if int_labels:
        assert inputs.shape[0] == target.shape[0], (
            "SoftTargetCrossEntropyLoss requires input and target to have "
            "same batch size!")
        t_arr = target.astype(jnp.int32).reshape(n, 1)
        t_row_bytes = 4
        tile_loss = functools.partial(_label_tile_loss, ignore_index=ignore_index,
                                      normalize_targets=normalize_targets)
    else:
        assert inputs.shape == target.shape, (
            f"SoftTargetCrossEntropyLoss requires input and target to be same "
            f"shape: {inputs.shape} != {target.shape}")
        t_arr = target                          # native dtype, no upcast
        t_row_bytes = c * target.dtype.itemsize
        tile_loss = functools.partial(_soft_tile_loss, ignore_index=ignore_index,
                                      normalize_targets=normalize_targets)

    tile_n = _pick_tile_n(n, c * inputs.dtype.itemsize, t_row_bytes, c, _tile_rows)
    num_tiles = pl.cdiv(n, tile_n)
    mask_rows = (n % tile_n) != 0

    x_spec = pl.BlockSpec((tile_n, c), lambda i: (i, 0))
    t_spec = pl.BlockSpec((tile_n, 1 if int_labels else c), lambda i: (i, 0))

    common = dict(tile_loss=tile_loss, tile_n=tile_n, n_rows=n, mask_rows=mask_rows)

    if reduction == "mean":
        kernel = functools.partial(_ce_mean_kernel, **common)
        out_shape = jax.ShapeDtypeStruct((1, 1), jnp.float32)
        out_spec = pl.BlockSpec((1, 1), lambda i: (0, 0))   # resident accumulator
        scratch = [pltpu.VMEM((1, 1), jnp.float32)]         # n_valid counter
        semantics = ("arbitrary",)
    else:
        kernel = functools.partial(_ce_none_kernel, **common)
        out_shape = jax.ShapeDtypeStruct((n, 1), jnp.float32)
        out_spec = pl.BlockSpec((tile_n, 1), lambda i: (i, 0))
        scratch = []
        semantics = ("parallel",)               # megacore sharding on v7x

    out = pl.pallas_call(
        kernel,
        out_shape=out_shape,
        grid_spec=pltpu.PrefetchScalarGridSpec(
            num_scalar_prefetch=0,
            grid=(num_tiles,),
            in_specs=[x_spec, t_spec],
            out_specs=out_spec,
            scratch_shapes=scratch),
        compiler_params=pltpu.CompilerParams(
            dimension_semantics=semantics,
            vmem_limit_bytes=_VMEM_LIMIT),
    )(inputs, t_arr)

    if reduction == "mean":
        return out[0, 0]
    return out[:, 0]


# --------------------------------------------------------------------------
# Pure-JAX reference (mirrors the PyTorch module) for verification
# --------------------------------------------------------------------------
def _reference(inputs, target, ignore_index=-100, reduction="mean",
               normalize_targets=True):
    inputs = jnp.asarray(inputs).astype(jnp.float32)
    target = jnp.asarray(target)
    if target.ndim == 1:
        target = jax.nn.one_hot(target.astype(jnp.int32), inputs.shape[1],
                                dtype=jnp.float32)
    target = target.astype(jnp.float32)
    n, c = target.shape
    valid_mask = jnp.ones((n, 1), jnp.float32)
    if 0 <= ignore_index <= c - 1:
        drop = target[:, ignore_index:ignore_index + 1] > 0
        valid_mask = jnp.where(drop, 0.0, 1.0)
    valid_targets = target * valid_mask
    if normalize_targets:
        valid_targets = valid_targets / (_F32_EPS +
                                         valid_targets.sum(-1, keepdims=True))
    logp = jax.nn.log_softmax(inputs, -1)
    per_sample = jnp.sum(-valid_targets * logp, -1)
    if reduction == "mean":
        denom = jnp.maximum(
            jnp.sum((valid_mask.sum(-1) > 0).astype(jnp.float32)), 1.0)
        return per_sample.sum() / denom
    return per_sample


if __name__ == "__main__":
    key = jax.random.PRNGKey(0)
    k1, k2, k3 = jax.random.split(key, 3)

    N, C = 20, 32
    logits = jax.random.normal(k1, (N, C), dtype=jnp.float32)
    soft_targets = (jax.random.uniform(k2, (N, C)) > 0.8).astype(jnp.float32)
    int_labels = jax.random.randint(k3, (N,), 0, C)

    TOL = dict(rtol=1e-4, atol=1e-5)

    # 1) mean + soft targets (single tile)
    loss_mean = soft_target_cross_entropy_loss(logits, soft_targets)
    jax.block_until_ready(loss_mean)
    assert jnp.allclose(loss_mean, _reference(logits, soft_targets), **TOL)

    # 2) none + soft targets, forced multi-tile with a remainder (tile=8, N=20)
    loss_none = soft_target_cross_entropy_loss(
        logits, soft_targets, reduction="none", _tile_rows=8)
    jax.block_until_ready(loss_none)
    assert jnp.allclose(loss_none, _reference(logits, soft_targets,
                                              reduction="none"), **TOL)

    # 3) mean + integer labels + ignore_index, multi-tile with remainder
    loss_lbl = soft_target_cross_entropy_loss(
        logits, int_labels, ignore_index=3, _tile_rows=8)
    jax.block_until_ready(loss_lbl)
    assert jnp.allclose(loss_lbl, _reference(logits, int_labels,
                                             ignore_index=3), **TOL)

    # 4) none + integer labels (no one-hot materialized in HBM)
    loss_lbl_none = soft_target_cross_entropy_loss(
        logits, int_labels, reduction="none")
    jax.block_until_ready(loss_lbl_none)
    assert jnp.allclose(loss_lbl_none, _reference(logits, int_labels,
                                                  reduction="none"), **TOL)

    # 5) bf16 logits streamed in native dtype, cast in-kernel
    loss_bf16 = soft_target_cross_entropy_loss(
        logits.astype(jnp.bfloat16), soft_targets)
    jax.block_until_ready(loss_bf16)
    assert jnp.allclose(loss_bf16, _reference(logits.astype(jnp.bfloat16),
                                              soft_targets), **TOL)

    print("KERNEL_OK")
</pallas_src>

<mosaic_0001>
module attributes {stable_mosaic.version = 11 : i64} {
  func.func @_ce_mean_kernel(%arg0: i32, %arg1: memref<20x32xf32, #tpu.memory_space<vmem>>, %arg2: memref<20x32xf32, #tpu.memory_space<vmem>>, %arg3: memref<1x1xf32, #tpu.memory_space<vmem>>, %arg4: memref<1x1xf32, #tpu.memory_space<vmem>>) attributes {dimension_semantics = [#tpu.dimension_semantics<arbitrary>], iteration_bounds = array<i64: 1>, scalar_prefetch = 0 : i64, scratch_operands = 1 : i64, tpu.core_type = #tpu.core_type<tc>, window_params = [{transform_indices = @transform_0, window_bounds = array<i64: 20, 32>}, {transform_indices = @transform_1, window_bounds = array<i64: 20, 32>}, {pipeline_mode = #tpu.pipeline_mode<synchronous>, transform_indices = @transform_2, window_bounds = array<i64: 1, 1>}]} {
    %c0_i32 = arith.constant 0 : i32
    %0 = arith.cmpi eq, %arg0, %c0_i32 : i32
    %1 = arith.extui %0 : i1 to i32
    %c0_i32_0 = arith.constant 0 : i32
    %2 = arith.cmpi ne, %1, %c0_i32_0 : i32
    scf.if %2 {
      %cst_22 = arith.constant 0.000000e+00 : f32
      %48 = vector.broadcast %cst_22 : f32 to vector<1x1xf32>
      %c0_23 = arith.constant 0 : index
      %c0_24 = arith.constant 0 : index
      %49 = vector.load %arg3[%c0_23, %c0_24] : memref<1x1xf32, #tpu.memory_space<vmem>>, vector<1x1xf32>
      tpu.vector_store %arg3[%c0_23, %c0_24], %48 {strides = array<i32>} : memref<1x1xf32, #tpu.memory_space<vmem>>, vector<1x1xf32>,
      %cst_25 = arith.constant 0.000000e+00 : f32
      %50 = vector.broadcast %cst_25 : f32 to vector<1x1xf32>
      %c0_26 = arith.constant 0 : index
      %c0_27 = arith.constant 0 : index
      %51 = vector.load %arg4[%c0_26, %c0_27] : memref<1x1xf32, #tpu.memory_space<vmem>>, vector<1x1xf32>
      tpu.vector_store %arg4[%c0_26, %c0_27], %50 {strides = array<i32>} : memref<1x1xf32, #tpu.memory_space<vmem>>, vector<1x1xf32>,
    } else {
    }
    %c0 = arith.constant 0 : index
    %c0_1 = arith.constant 0 : index
    %3 = vector.load %arg1[%c0, %c0_1] : memref<20x32xf32, #tpu.memory_space<vmem>>, vector<20x32xf32>
    %c0_2 = arith.constant 0 : index
    %c0_3 = arith.constant 0 : index
    %4 = vector.load %arg2[%c0_2, %c0_3] : memref<20x32xf32, #tpu.memory_space<vmem>>, vector<20x32xf32>
    %cst = arith.constant 1.000000e+00 : f32
    %5 = vector.broadcast %cst : f32 to vector<20x1xf32>
    %6 = vector.broadcast %5 : vector<20x1xf32> to vector<20x32xf32>
    %7 = arith.mulf %4, %6 : vector<20x32xf32>
    %cst_4 = arith.constant dense<0.000000e+00> : vector<20xf32>
    %8 = vector.multi_reduction <add>, %7, %cst_4 [1] : vector<20x32xf32> to vector<20xf32>
    %9 = vector.shape_cast %8 : vector<20xf32> to vector<20x1xf32>
    %cst_5 = arith.constant 1.1920929E-7 : f32
    %10 = vector.broadcast %cst_5 : f32 to vector<20x1xf32>
    %11 = arith.addf %10, %9 : vector<20x1xf32>
    %12 = vector.broadcast %11 : vector<20x1xf32> to vector<20x32xf32>
    %13 = arith.divf %7, %12 : vector<20x32xf32>
    %cst_6 = arith.constant dense<0xFF800000> : vector<20xf32>
    %14 = vector.multi_reduction <maximumf>, %3, %cst_6 [1] : vector<20x32xf32> to vector<20xf32>
    %15 = vector.shape_cast %14 : vector<20xf32> to vector<20x1xf32>
    %16 = vector.broadcast %15 : vector<20x1xf32> to vector<20x32xf32>
    %17 = arith.subf %3, %16 : vector<20x32xf32>
    %18 = math.exp %17 : vector<20x32xf32>
    %cst_7 = arith.constant dense<0.000000e+00> : vector<20xf32>
    %19 = vector.multi_reduction <add>, %18, %cst_7 [1] : vector<20x32xf32> to vector<20xf32>
    %20 = vector.shape_cast %19 : vector<20xf32> to vector<20x1xf32>
    %21 = math.log %20 : vector<20x1xf32>
    %cst_8 = arith.constant dense<0.000000e+00> : vector<20xf32>
    %22 = vector.multi_reduction <add>, %13, %cst_8 [1] : vector<20x32xf32> to vector<20xf32>
    %23 = vector.shape_cast %22 : vector<20xf32> to vector<20x1xf32>
    %24 = arith.mulf %13, %17 : vector<20x32xf32>
    %cst_9 = arith.constant dense<0.000000e+00> : vector<20xf32>
    %25 = vector.multi_reduction <add>, %24, %cst_9 [1] : vector<20x32xf32> to vector<20xf32>
    %26 = vector.shape_cast %25 : vector<20xf32> to vector<20x1xf32>
    %27 = arith.mulf %23, %21 : vector<20x1xf32>
    %28 = arith.subf %27, %26 : vector<20x1xf32>
    %c0_10 = arith.constant 0 : index
    %c0_11 = arith.constant 0 : index
    %29 = vector.load %arg3[%c0_10, %c0_11] : memref<1x1xf32, #tpu.memory_space<vmem>>, vector<1x1xf32>
    %30 = vector.shape_cast %28 : vector<20x1xf32> to vector<1x20x1xf32>
    %cst_12 = arith.constant dense<0.000000e+00> : vector<1xf32>
    %31 = vector.multi_reduction <add>, %30, %cst_12 [1, 2] : vector<1x20x1xf32> to vector<1xf32>
    %32 = vector.shape_cast %31 : vector<1xf32> to vector<1x1x1xf32>
    %33 = vector.extract %32[0, 0, 0] : f32 from vector<1x1x1xf32>
    %34 = vector.broadcast %33 : f32 to vector<1x1xf32>
    %35 = arith.addf %29, %34 : vector<1x1xf32>
    %c0_13 = arith.constant 0 : index
    %c0_14 = arith.constant 0 : index
    %36 = vector.load %arg3[%c0_13, %c0_14] : memref<1x1xf32, #tpu.memory_space<vmem>>, vector<1x1xf32>
    tpu.vector_store %arg3[%c0_13, %c0_14], %35 {strides = array<i32>} : memref<1x1xf32, #tpu.memory_space<vmem>>, vector<1x1xf32>,
    %c0_15 = arith.constant 0 : index
    %c0_16 = arith.constant 0 : index
    %37 = vector.load %arg4[%c0_15, %c0_16] : memref<1x1xf32, #tpu.memory_space<vmem>>, vector<1x1xf32>
    %38 = vector.shape_cast %5 : vector<20x1xf32> to vector<1x20x1xf32>
    %cst_17 = arith.constant dense<0.000000e+00> : vector<1xf32>
    %39 = vector.multi_reduction <add>, %38, %cst_17 [1, 2] : vector<1x20x1xf32> to vector<1xf32>
    %40 = vector.shape_cast %39 : vector<1xf32> to vector<1x1x1xf32>
    %41 = vector.extract %40[0, 0, 0] : f32 from vector<1x1x1xf32>
    %42 = vector.broadcast %41 : f32 to vector<1x1xf32>
    %43 = arith.addf %37, %42 : vector<1x1xf32>
    %c0_18 = arith.constant 0 : index
    %c0_19 = arith.constant 0 : index
    %44 = vector.load %arg4[%c0_18, %c0_19] : memref<1x1xf32, #tpu.memory_space<vmem>>, vector<1x1xf32>
    tpu.vector_store %arg4[%c0_18, %c0_19], %43 {strides = array<i32>} : memref<1x1xf32, #tpu.memory_space<vmem>>, vector<1x1xf32>,
    %c0_i32_20 = arith.constant 0 : i32
    %45 = arith.cmpi eq, %arg0, %c0_i32_20 : i32
    %46 = arith.extui %45 : i1 to i32
    %c0_i32_21 = arith.constant 0 : i32
    %47 = arith.cmpi ne, %46, %c0_i32_21 : i32
    scf.if %47 {
      %c0_22 = arith.constant 0 : index
      %c0_23 = arith.constant 0 : index
      %48 = vector.load %arg3[%c0_22, %c0_23] : memref<1x1xf32, #tpu.memory_space<vmem>>, vector<1x1xf32>
      %c0_24 = arith.constant 0 : index
      %c0_25 = arith.constant 0 : index
      %49 = vector.load %arg4[%c0_24, %c0_25] : memref<1x1xf32, #tpu.memory_space<vmem>>, vector<1x1xf32>
      %cst_26 = arith.constant 1.000000e+00 : f32
      %50 = vector.broadcast %cst_26 : f32 to vector<1x1xf32>
      %51 = arith.maximumf %49, %50 : vector<1x1xf32>
      %52 = arith.divf %48, %51 : vector<1x1xf32>
      %c0_27 = arith.constant 0 : index
      %c0_28 = arith.constant 0 : index
      %53 = vector.load %arg3[%c0_27, %c0_28] : memref<1x1xf32, #tpu.memory_space<vmem>>, vector<1x1xf32>
      tpu.vector_store %arg3[%c0_27, %c0_28], %52 {strides = array<i32>} : memref<1x1xf32, #tpu.memory_space<vmem>>, vector<1x1xf32>,
    } else {
    }
    return
  }
  func.func @transform_0(%arg0: i32) -> (i32, i32) {
    %c0_i32 = arith.constant 0 : i32
    %c0_i32_0 = arith.constant 0 : i32
    return %arg0, %c0_i32 : i32, i32
  }
  func.func @transform_1(%arg0: i32) -> (i32, i32) {
    %c0_i32 = arith.constant 0 : i32
    %c0_i32_0 = arith.constant 0 : i32
    return %arg0, %c0_i32 : i32, i32
  }
  func.func @transform_2(%arg0: i32) -> (i32, i32) {
    %c0_i32 = arith.constant 0 : i32
    %c0_i32_0 = arith.constant 0 : i32
    %c0_i32_1 = arith.constant 0 : i32
    return %c0_i32, %c0_i32_0 : i32, i32
  }
}

</mosaic_0001>

<bundles_post_ra>
// kernel: tpu_custom_call.1
= control target key start
LH: loop header
LB: loop body
LE: loop exit
PB: predicated region body
PF: predicated region fallthrough
CT: control target
= control target key end

     0   :  { %7 = vsyncpa [#allocation4], 0  ;;  %s447_s0 = inlined_call_operand.hbm [shape: f32[20,32], index: 0, kind: input, shape index: {}]   ;;  %s448_s1 = inlined_call_operand.hbm [shape: f32[20,32], index: 1, kind: input, shape index: {}]   ;;  %s449_s2 = inlined_call_operand.hbm [shape: f32[1,1], index: 2, kind: output, shape index: {}]  }
   0x1   :  { %8 = vsyncpa [#allocation7], 0 }
   0x2   :  { %9 = vsyncpa [#allocation5], 0  ;;  %s14_s11 = sshll.u32 %s447_s0, 4  ;;  %s362_s12 = smov [#allocation3]   ;;  %s15_s11 = int_to_ptr.hbm [resolvable:$true] %s14_s11 }
   0x3   :  { %s16_s13 = sshll.u32 %s362_s12, 4  ;;  %s27_s16 = sshll.u32 %s448_s1, 4  ;;  %s17_s13 = int_to_ptr.vmem [resolvable:$true] %s16_s13  ;;  %s28_s16 = int_to_ptr.hbm [resolvable:$true] %s27_s16 }
   0x4   :  { %s363_s17 = smov 128   ;;  %s364_s18 = smov 8  }
   0x5   :  { %22 = dma.hbm_to_vmem [thread:$0]  %s15_s11, 384, %s17_s13, [#allocation4], %s363_s17, %s363_s17, %s364_s18  }
   0x6   :  { %s365_s19 = smov [#allocation6]  }
   0x7   :  { %s29_s20 = sshll.u32 %s365_s19, 4  ;;  %s30_s20 = int_to_ptr.vmem [resolvable:$true] %s29_s20 }
   0x8   :  { %35 = dma.hbm_to_vmem [thread:$0]  %s28_s16, 384, %s30_s20, [#allocation7], %s363_s17, %s363_s17, %s364_s18  }
   0x9   :  { %356 = dma.done.wait [#allocation4], 384  }
   0xa   :  { %357 = vsyncadd [#allocation4], 4294966912 }
   0xb   :  { %358 = dma.done.wait [#allocation7], 384  }
   0xc   :  { %359 = vsyncadd [#allocation7], 4294966912  ;;  %vm64_vm0 = vcmask 257024   ;;  %vm57_vm1 = vcmask 261120   ;;  %v389_v0 = vld [vmem:[#allocation6 + $0x10] sm:$0xf] }
   0xd   :  { %v391_v1 = vld [vmem:[#allocation6] sm:$0xff]  ;;  %v51_v2 = vld [vmem:[#allocation3] sm:$0xff]  ;;  %v65_v3 = vsel %vm64_vm0, %v389_v0, 0.0  ;;  %v53_v7 = vld [vmem:[#allocation3 + $0x10] sm:$0xf]  ;;  %vm177_vm14 = vcmask 7168  }
   0xe   :  { %v58_v4 = vsel %vm57_vm1, %v391_v1, 0.0  ;;  %v116_v5 = vsel %vm57_vm1, %v51_v2, -inf  ;;  %66 = vadd.xlane.f32.xlu2 %v65_v3  ;;  %v398_v6 = vld [vmem:[#allocation6 + $0x8] sm:$0xff]  ;;  %v52_v8 = vld [vmem:[#allocation3 + $0x8] sm:$0xff]  ;;  %v122_v10 = vsel %vm64_vm0, %v53_v7, -inf  ;;  %vm181_vm15 = vcmask 3072  }
   0xf   :  { %59 = vadd.xlane.f32.xlu0 %v58_v4  ;;  %117 = vmax.xlane.f32.xlu1 %v116_v5  ;;  %v61_v9 = vsel %vm57_vm1, %v398_v6, 0.0  ;;  %v119_v11 = vsel %vm57_vm1, %v52_v8, -inf  ;;  %s367_s21 = smov [#allocation8]   ;;  %s243_s25 = sshll.u32 %s449_s2, 4  ;;  %s244_s25 = int_to_ptr.hbm [resolvable:$true] %s243_s25 }
  0x10   :  { %s241_s22 = sshll.u32 %s367_s21, 4  ;;  %s242_s22 = int_to_ptr.vmem [resolvable:$true] %s241_s22 }
  0x16   :  { %123 = vmax.xlane.f32.xlu2 %v122_v10 }
  0x17   :  { %62 = vadd.xlane.f32.xlu0 %v61_v9  ;;  %120 = vmax.xlane.f32.xlu1 %v119_v11 }
  0x81   :  { %v67_v12 = vpop.xlane.xlu2 %66 }
  0x82   :  { %v60_v13 = vpop.xlane.xlu0 %59  ;;  %v70_v14 = vadd.f32 1.1920929e-07, %v67_v12  ;;  %v118_v16 = vpop.xlane.xlu1 %117 }
  0x83   :  { %v68_v15 = vadd.f32 1.1920929e-07, %v60_v13  ;;  %v404_v17 = vsub.f32 %v51_v2, %v118_v16  ;;  %v366_v13 = vmov 0.0  }
  0x84   :  { %264 = vrcp.f32 %v70_v14  ;;  %v112_v39 = vand.u32 2147483648, %v70_v14  ;;  %vm106_vm4 = vweird.f32 %v70_v14  ;;  %v110_v41 = vand.u32 2147483647, %v70_v14 }
  0x85   :  { %266 = vrcp.f32 %v68_v15  ;;  %v128_v18 = vmul.f32 1.442695, %v404_v17  ;;  %v82_v35 = vand.u32 2147483648, %v68_v15  ;;  %v80_v38 = vand.u32 2147483647, %v68_v15 }
  0x86   :  { %vm76_vm5 = vweird.f32 %v68_v15  ;;  %v113_v50 = vor.u32 1.1754944e-38, %v112_v39  ;;  %vm111_vm9 = vcmp.eq.f32.partialorder %v110_v41, 8.507059e+37 }
  0x87   :  { %268 = vpow2.f32 %v128_v18  ;;  %v83_v46 = vor.u32 1.1754944e-38, %v82_v35  ;;  %vm81_vm8 = vcmp.eq.f32.partialorder %v80_v38, 8.507059e+37 }
  0x89   :  { %v124_v20 = vpop.xlane.xlu2 %123 }
  0x8a   :  { %v63_v19 = vpop.xlane.xlu0 %62  ;;  %v265_v21 = vpop.eup %264  ;;  %v407_v23 = vsub.f32 %v53_v7, %v124_v20 }
  0x8b   :  { %v69_v22 = vadd.f32 1.1920929e-07, %v63_v19  ;;  %v121_v24 = vpop.xlane.xlu1 %120  ;;  %v267_v25 = vpop.eup %266  ;;  %v102_v26 = vmul.f32 %v265_v21, %v70_v14  ;;  %vm107_vm2 = vweird.f32 %v265_v21 }
  0x8c   :  { %v409_v27 = vsub.f32 %v52_v8, %v121_v24  ;;  %v72_v28 = vmul.f32 %v267_v25, %v68_v15  ;;  %v132_v29 = vmul.f32 1.442695, %v407_v23  ;;  %vm77_vm3 = vweird.f32 %v267_v25  ;;  %vm414_vm6 = vmor %vm106_vm4, %vm107_vm2 }
  0x8d   :  { %270 = vrcp.f32 %v69_v22  ;;  %v269_v30 = vpop.eup %268  ;;  %v103_v31 = vsub.f32 1.0, %v102_v26  ;;  %vm78_vm7 = vmor %vm76_vm5, %vm77_vm3  ;;  %v97_v58 = vand.u32 2147483648, %v69_v22  ;;  %v95_v60 = vand.u32 2147483647, %v69_v22 }
  0x8e   :  { %v130_v32 = vmul.f32 1.442695, %v409_v27  ;;  %v73_v33 = vsub.f32 1.0, %v72_v28  ;;  %272 = vpow2.f32 %v132_v29  ;;  %v134_v34 = vsel %vm57_vm1, %v269_v30, 0.0 }
  0x8f   :  { %135 = vadd.xlane.f32.xlu0 %v134_v34  ;;  %v104_v36 = vmul.f32 %v265_v21, %v103_v31  ;;  %vm91_vm11 = vweird.f32 %v69_v22  ;;  %v98_v2 = vor.u32 1.1754944e-38, %v97_v58  ;;  %vm96_vm13 = vcmp.eq.f32.partialorder %v95_v60, 8.507059e+37 }
  0x90   :  { %274 = vpow2.f32 %v130_v32  ;;  %v74_v37 = vmul.f32 %v267_v25, %v73_v33  ;;  %v200_v15 = vsel %vm181_vm15, 1.0, %v366_v13  ;;  %vm48_vm2 = vcmask 0  }
  0x91   :  { %v105_v40 = vadd.f32 %v265_v21, %v104_v36  ;;  %49 = vst.msk [vmem:[#allocation8] sm:$0x1] %vm48_vm2, %v366_v13 }
  0x92   :  { %v75_v43 = vadd.f32 %v267_v25, %v74_v37  ;;  %50 = vst.msk [vmem:[#allocation2] sm:$0x1] %vm48_vm2, %v366_v13 }
  0x93   :  { %v271_v42 = vpop.eup %270  ;;  %v109_v47 = vsel %vm414_vm6, %v265_v21, %v105_v40 }
  0x94   :  { %v87_v45 = vmul.f32 %v271_v42, %v69_v22  ;;  %v273_v48 = vpop.eup %272  ;;  %v79_v49 = vsel %vm78_vm7, %v267_v25, %v75_v43  ;;  %v114_v57 = vsel %vm111_vm9, %v113_v50, %v109_v47  ;;  %vm92_vm10 = vweird.f32 %v271_v42 }
  0x95   :  { %v140_v53 = vsel %vm64_vm0, %v273_v48, 0.0  ;;  %v84_v54 = vsel %vm81_vm8, %v83_v46, %v79_v49  ;;  %v115_v62 = vmul.f32 %v114_v57, %v389_v0  ;;  %vm93_vm12 = vmor %vm91_vm11, %vm92_vm10 }
  0x96   :  { %v275_v51 = vpop.eup %274  ;;  %v88_v52 = vsub.f32 1.0, %v87_v45  ;;  %141 = vadd.xlane.f32.xlu2 %v140_v53  ;;  %v85_v56 = vmul.f32 %v84_v54, %v391_v1 }
  0x97   :  { %v137_v55 = vsel %vm57_vm1, %v275_v51, 0.0  ;;  %v155_v5 = vsel %vm64_vm0, %v115_v62, 0.0  ;;  %v160_v0 = vmul.f32 %v407_v23, %v115_v62 }
  0x98   :  { %138 = vadd.xlane.f32.xlu1 %v137_v55  ;;  %v89_v59 = vmul.f32 %v271_v42, %v88_v52  ;;  %v149_v61 = vsel %vm57_vm1, %v85_v56, 0.0  ;;  %v158_v4 = vmul.f32 %v404_v17, %v85_v56  ;;  %v176_v57 = vld [vmem:[#allocation8] sm:$0x1] }
  0x99   :  { %150 = vadd.xlane.f32.xlu0 %v149_v61  ;;  %v167_v11 = vsel %vm64_vm0, %v160_v0, 0.0  ;;  %v197_v58 = vld [vmem:[#allocation2] sm:$0x1] }
  0x9a   :  { %v90_v63 = vadd.f32 %v271_v42, %v89_v59  ;;  %v161_v9 = vsel %vm57_vm1, %v158_v4, 0.0 }
  0x9c   :  { %v94_v3 = vsel %vm93_vm12, %v271_v42, %v90_v63 }
  0x9d   :  { %v99_v1 = vsel %vm96_vm13, %v98_v2, %v94_v3 }
  0x9e   :  { %v100_v7 = vmul.f32 %v99_v1, %v398_v6  ;;  %156 = vadd.xlane.f32.xlu2 %v155_v5  ;;  %v198_v6 = vsel %vm177_vm14, 1.0, %v366_v13 }
  0x9f   :  { %v199_v14 = vadd.f32 %v198_v6, %v198_v6 }
  0xa0   :  { %v152_v8 = vsel %vm57_vm1, %v100_v7, 0.0  ;;  %v159_v10 = vmul.f32 %v409_v27, %v100_v7 }
  0xa1   :  { %153 = vadd.xlane.f32.xlu1 %v152_v8  ;;  %162 = vadd.xlane.f32.xlu0 %v161_v9  ;;  %v201_v16 = vadd.f32 %v200_v15, %v199_v14 }
  0xa2   :  { %v164_v12 = vsel %vm57_vm1, %v159_v10, 0.0 }
  0xa6   :  { %168 = vadd.xlane.f32.xlu2 %v167_v11 }
  0xa9   :  { %165 = vadd.xlane.f32.xlu1 %v164_v12 }
  0xb1   :  { %202 = vadd.xlane.f32.xlu1 %v201_v16 }
 0x102   :  { %v136_v17 = vpop.xlane.xlu0 %135 }
 0x103   :  { %276 = vlog2.f32 %v136_v17 }
 0x109   :  { %v142_v18 = vpop.xlane.xlu2 %141  ;;  %v277_v21 = vpop.eup %276 }
 0x10a   :  { %278 = vlog2.f32 %v142_v18  ;;  %v144_v26 = vmul.f32 0.6931472, %v277_v21 }
 0x10b   :  { %v139_v19 = vpop.xlane.xlu1 %138 }
 0x10c   :  { %280 = vlog2.f32 %v139_v19  ;;  %v151_v20 = vpop.xlane.xlu0 %150 }
 0x10d   :  { %v170_v30 = vmul.f32 %v151_v20, %v144_v26 }
 0x110   :  { %v279_v23 = vpop.eup %278 }
 0x111   :  { %v157_v22 = vpop.xlane.xlu2 %156  ;;  %v148_v27 = vmul.f32 0.6931472, %v279_v23 }
 0x112   :  { %v281_v24 = vpop.eup %280 }
 0x113   :  { %v146_v28 = vmul.f32 0.6931472, %v281_v24  ;;  %v172_v32 = vmul.f32 %v157_v22, %v148_v27 }
 0x114   :  { %v154_v25 = vpop.xlane.xlu1 %153  ;;  %v163_v29 = vpop.xlane.xlu0 %162 }
 0x115   :  { %v173_v33 = vsub.f32 %v170_v30, %v163_v29  ;;  %v171_v34 = vmul.f32 %v154_v25, %v146_v28 }
 0x117   :  { %v178_v38 = vsel %vm177_vm14, %v173_v33, 0.0 }
 0x119   :  { %v169_v31 = vpop.xlane.xlu2 %168 }
 0x11a   :  { %v175_v36 = vsub.f32 %v172_v32, %v169_v31 }
 0x11c   :  { %v166_v35 = vpop.xlane.xlu1 %165  ;;  %v182_v41 = vsel %vm181_vm15, %v175_v36, 0.0 }
 0x11d   :  { %v174_v37 = vsub.f32 %v171_v34, %v166_v35 }
 0x11f   :  { %v179_v39 = vsel %vm177_vm14, %v174_v37, 0.0 }
 0x120   :  { %v180_v40 = vadd.f32 %v179_v39, %v178_v38 }
 0x122   :  { %v183_v42 = vadd.f32 %v182_v41, %v180_v40 }
 0x124   :  { %184 = vadd.xlane.f32.xlu0 %v183_v42  ;;  %v203_v43 = vpop.xlane.xlu1 %202 }
 0x125   :  { %v204_v44 = vrot.slane %v203_v43, 4 }
 0x127   :  { %v205_v45 = vadd.f32 %v204_v44, %v203_v43 }
 0x129   :  { %v206_v46 = vrot.slane %v205_v45, 2 }
 0x12b   :  { %v207_v50 = vadd.f32 %v206_v46, %v205_v45 }
 0x12d   :  { %v208_v53 = vrot.slane %v207_v50, 1 }
 0x12f   :  { %v209_v56 = vadd.f32 %v208_v53, %v207_v50 }
 0x197   :  { %v185_v47 = vpop.xlane.xlu0 %184 }
 0x198   :  { %v186_v48 = vrot.slane %v185_v47, 4 }
 0x19a   :  { %v187_v49 = vadd.f32 %v186_v48, %v185_v47 }
 0x19c   :  { %v188_v51 = vrot.slane %v187_v49, 2 }
 0x19e   :  { %v189_v52 = vadd.f32 %v188_v51, %v187_v49 }
 0x1a0   :  { %v190_v54 = vrot.slane %v189_v52, 1 }
 0x1a2   :  { %v191_v55 = vadd.f32 %v190_v54, %v189_v52 }
 0x1a4   :  { %254 = vpush %v191_v55 }
 0x1a5   :  { %256 = vpush %v209_v56 }
 0x1d5   :  { %s255_s0 = spop %254 }
 0x1d6   :  { %v193_v59 = vstv %s255_s0  ;;  %s257_s1 = spop %256 }
 0x1d7   :  { %v194_v60 = vadd.f32 %v193_v59, %v176_v57  ;;  %v211_v61 = vstv %s257_s1 }
 0x1d8   :  { %v212_v62 = vadd.f32 %v211_v61, %v197_v58 }
 0x1d9   :  { %196 = vst.msk [vmem:[#allocation8] sm:$0x1] %vm48_vm2, %v194_v60 }
 0x1da   :  { %213 = vst.msk [vmem:[#allocation2] sm:$0x1] %vm48_vm2, %v212_v62 }
 0x1e0   :  { %v217_v11 = vld [vmem:[#allocation8] sm:$0x1] }
 0x1e1   :  { %v218_v63 = vld [vmem:[#allocation2] sm:$0x1] }
 0x1e2   :  { %v219_v2 = vmax.f32 %v218_v63, 1.0 }
 0x1e4   :  { %282 = vrcp.f32 %v219_v2  ;;  %v231_v5 = vand.u32 2147483648, %v219_v2  ;;  %v229_v8 = vand.u32 2147483647, %v219_v2  ;;  %vm225_vm1 = vweird.f32 %v219_v2 }
 0x1e6   :  { %v232_v0 = vor.u32 1.1754944e-38, %v231_v5  ;;  %vm230_vm4 = vcmp.eq.f32.partialorder %v229_v8, 8.507059e+37 }
 0x1ea   :  { %v283_v3 = vpop.eup %282 }
 0x1eb   :  { %v221_v4 = vmul.f32 %v283_v3, %v219_v2  ;;  %vm226_vm0 = vweird.f32 %v283_v3 }
 0x1ec   :  { %vm227_vm3 = vmor %vm225_vm1, %vm226_vm0 }
 0x1ed   :  { %v222_v1 = vsub.f32 1.0, %v221_v4 }
 0x1ef   :  { %v223_v7 = vmul.f32 %v283_v3, %v222_v1 }
 0x1f1   :  { %v224_v9 = vadd.f32 %v283_v3, %v223_v7 }
 0x1f3   :  { %v228_v10 = vsel %vm227_vm3, %v283_v3, %v224_v9 }
 0x1f4   :  { %v233_v12 = vsel %vm230_vm4, %v232_v0, %v228_v10 }
 0x1f5   :  { %v234_v13 = vmul.f32 %v233_v12, %v217_v11 }
 0x1f7   :  { %235 = vst.msk [vmem:[#allocation8] sm:$0x1] %vm48_vm2, %v234_v13 }
 0x1f8   :  { %246 = dma.vmem_to_hbm [thread:$0]  %s242_s22, 16, %s244_s25, [#allocation5]  }
 0x1f9   :  { %360 = dma.done.wait [#allocation5], 16  }
 0x1fa   :  { %361 = vsyncadd [#allocation5], 4294967280 }
 0x1fb   :  { %251 = vsyncpa [#allocation4], 1 }
 0x1fc   :  { %252 = vsyncpa [#allocation7], 1 }
 0x1fd   :  { %253 = vsyncpa [#allocation5], 1 }

</bundles_post_ra>
